<compile_context>
chip_gen: v6e
topology: v6e:2x2x1
jax: 0.10.0
libtpu: 0.0.40
codegen_flags: <defaults>
</compile_context>

<pallas_src>
import functools

import jax
import jax.numpy as jnp
import numpy as np
from jax.experimental import pallas as pl
from jax.experimental.pallas import tpu as pltpu


# ----------------------------- Pallas kernel --------------------------------
def _one_hot(idx, num_ids, dtype):
    """(TB, C) int32 indices -> (TB, num_ids*C) one-hot rows.

    Column v*C + c is 1 iff idx[b, c] == v.  Built with iota + lane-concat +
    compare only (no gather), so it lowers cleanly in Mosaic.  Garbage indices
    in padded batch rows are harmless (no memory is addressed by them).
    """
    TB, C = idx.shape
    code = idx * C + jax.lax.broadcasted_iota(jnp.int32, (TB, C), 1)   # idx*C + c
    code_t = jnp.concatenate([code] * num_ids, axis=1)                 # col k -> code[b, k % C]
    col = jax.lax.broadcasted_iota(jnp.int32, (TB, num_ids * C), 1)
    return jnp.where(code_t == col, 1.0, 0.0).astype(dtype)


def tagger4_kernel(cidx_ref, widx_ref, wchar_ref, convb_ref,
                   w1w_ref, w1c_ref, b1_ref, w2_ref, b2_ref, out_ref):
    # cidx_ref : (TB, Cs)        int32 char indices for this batch tile
    # widx_ref : (TB, Wn)        int32 word indices
    # wchar_ref: (Vc*Cs, L*128)  bf16  char-emb gather (+) banded Conv1d, O padded to 128/group
    # convb_ref: (1, 128)        f32   conv bias (lanes >= O are 0)
    # w1w_ref  : (Vw*Wn, 128)    bf16  word-emb gather (+) layer1 word block, H padded to 128
    # w1c_ref  : (128, 128)      bf16  layer1 char block (rows >= O, cols >= H are 0)
    # b1_ref   : (1, 128)        f32   layer1 bias (lanes >= H are 0)
    # w2_ref   : (128, 128)      bf16  layer2 weight (rows >= H, cols >= Od are 0)
    # b2_ref   : (1, 128)        f32   layer2 bias (lanes >= Od are -1e30 -> masked in softmax)
    # out_ref  : (TB, 128)       f32   log-probabilities (lanes >= Od are junk, sliced outside)
    TB, Cs = cidx_ref.shape
    _, Wn = widx_ref.shape
    Vc = wchar_ref.shape[0] // Cs
    Vw = w1w_ref.shape[0] // Wn
    L = wchar_ref.shape[1] // 128

    # ---- char path: one-hot -> folded banded conv (one MXU matmul) -> group max ----
    onehot_c = _one_hot(cidx_ref[...], Vc, wchar_ref.dtype)            # (TB, Vc*Cs)
    conv = jnp.dot(onehot_c, wchar_ref[...],
                   preferred_element_type=jnp.float32)                 # (TB, L*128)
    cmax = conv[:, 0:128]
    for l in range(1, L):                                              # MaxPool1d over all L
        cmax = jnp.maximum(cmax, conv[:, l * 128:(l + 1) * 128])
    chars_feat = cmax + convb_ref[...]                                 # bias after max (monotone)

    # ---- word path + layer1 (word-embedding gather folded into w1w) ----
    onehot_w = _one_hot(widx_ref[...], Vw, w1w_ref.dtype)              # (TB, Vw*Wn)
    h = jnp.tanh(
        jnp.dot(onehot_w, w1w_ref[...], preferred_element_type=jnp.float32)
        + jnp.dot(chars_feat.astype(w1c_ref.dtype), w1c_ref[...],
                  preferred_element_type=jnp.float32)
        + b1_ref[...])                                                 # (TB, 128); pad cols == 0

    # ---- layer2 + log-softmax in f32; padded logit lanes sit at -1e30 ----
    logits = jnp.dot(h.astype(w2_ref.dtype), w2_ref[...],
                     preferred_element_type=jnp.float32) + b2_ref[...]
    m = jnp.max(logits, axis=-1, keepdims=True)
    s = logits - m
    lse = jnp.log(jnp.sum(jnp.exp(s), axis=-1, keepdims=True))
    out_ref[...] = s - lse


# ------------------------------ JAX wrapper ----------------------------------
@functools.partial(jax.jit, static_argnames=("num_words", "embed_size", "tile_b"))
def tagger4_forward(words_idxs, chars_idxs, params, *, num_words, embed_size,
                    tile_b=256):
    # TODO(synk): Dropout(0.5) reproduced in eval mode (identity); train-mode RNG
    #             masking is not part of the deterministic forward implemented here.
    del num_words  # derived from words_idxs.shape below
    B, Cs = chars_idxs.shape               # Cs = chars_size
    Wn = words_idxs.shape[1]               # Wn = num_words
    E = embed_size

    char_emb = params["char_emb"].astype(jnp.float32)   # (Vc, L)   L = c_embed_size
    word_emb = params["word_emb"].astype(jnp.float32)   # (Vw, E)
    Vc, L = char_emb.shape
    Vw = word_emb.shape[0]
    Wc = params["conv_w"].astype(jnp.float32)           # (O, c_embed_size, 3)
    convb = params["conv_b"].astype(jnp.float32)        # (O,)
    W1 = params["W1"].astype(jnp.float32)               # (H, Wn*E + O)
    b1 = params["b1"].astype(jnp.float32)
    W2 = params["W2"].astype(jnp.float32)               # (Od, H)
    b2 = params["b2"].astype(jnp.float32)
    O = Wc.shape[0]
    Od, H = W2.shape
    Dw = Wn * E
    HP = 128                                            # lane-dense padded width
    LP = L * 128                                        # pre-pool conv columns (O -> 128 per group)

    # The original module's forward only runs when chars_size == c_embed_size
    # (the embedding output is fed to Conv1d in NCL layout with dim1 as channels).
    if Cs != Wc.shape[1] or L != Wc.shape[1]:
        raise ValueError("Tagger4Model requires chars_size == c_embed_size")

    hi = jax.lax.Precision.HIGHEST

    # ---- banded conv weight: band[l_in, c, l_out, o] = Wc[o, c, l_in - l_out + 1] ----
    # (zeros encode the padding=1 boundaries and the O -> 128 lane padding)
    band = jnp.zeros((L, Cs, L, 128), jnp.float32)
    for k in range(3):
        for l_out in range(L):
            l_in = l_out + k - 1
            if 0 <= l_in < L:
                band = band.at[l_in, :, l_out, :O].set(Wc[:, :, k].T)
    # Fold the char-embedding gather in: row order (v, c) -> v*Cs + c.
    # NOTE: folding the tables assumes small embedding tables (true for this
    # module's char corpus / test vocab); for a huge word vocab keep the word
    # gather outside the kernel instead.
    w_char = jnp.einsum("vl,lcmo->vcmo", char_emb, band,
                        precision=hi).reshape(Vc * Cs, LP).astype(jnp.bfloat16)
    convb_pad = jnp.zeros((1, 128), jnp.float32).at[0, :O].set(convb)

    # ---- layer1: word block folded with the word-embedding gather, rows v*Wn + w ----
    w1w = jnp.einsum("ve,hwe->vwh", word_emb, W1[:, :Dw].reshape(H, Wn, E),
                     precision=hi).reshape(Vw * Wn, H)
    w1w = jnp.zeros((Vw * Wn, HP), jnp.float32).at[:, :H].set(w1w).astype(jnp.bfloat16)
    w1c = jnp.zeros((HP, HP), jnp.float32).at[:O, :H].set(W1[:, Dw:].T).astype(jnp.bfloat16)
    b1_pad = jnp.zeros((1, HP), jnp.float32).at[0, :H].set(b1)

    # ---- layer2: H and Od zero-padded to 128; padded logit lanes biased to -1e30 ----
    w2 = jnp.zeros((HP, HP), jnp.float32).at[:H, :Od].set(W2.T).astype(jnp.bfloat16)
    b2_pad = jnp.full((1, HP), -1e30, jnp.float32).at[0, :Od].set(b2)

    # ---- batch tiling: single tile for small B, >= 2 tiles for large B (v7x: 2 TCs) ----
    if B <= 16:
        TB = B
    else:
        TB = min(tile_b, ((B + 1) // 2 + 7) // 8 * 8)
    grid_b = pl.cdiv(B, TB)

    out = pl.pallas_call(
        tagger4_kernel,
        out_shape=jax.ShapeDtypeStruct((B, HP), jnp.float32),
        grid_spec=pltpu.PrefetchScalarGridSpec(
            num_scalar_prefetch=0,
            grid=(grid_b,),
            in_specs=[
                pl.BlockSpec((TB, Cs), lambda b: (b, 0)),        # char indices
                pl.BlockSpec((TB, Wn), lambda b: (b, 0)),        # word indices
                pl.BlockSpec((Vc * Cs, LP), lambda b: (0, 0)),   # folded char-emb x banded conv
                pl.BlockSpec((1, 128), lambda b: (0, 0)),        # conv bias (padded)
                pl.BlockSpec((Vw * Wn, HP), lambda b: (0, 0)),   # folded word-emb x L1 word block
                pl.BlockSpec((HP, HP), lambda b: (0, 0)),        # L1 char block
                pl.BlockSpec((1, HP), lambda b: (0, 0)),         # b1 (padded)
                pl.BlockSpec((HP, HP), lambda b: (0, 0)),        # W2 (padded)
                pl.BlockSpec((1, HP), lambda b: (0, 0)),         # b2 (-1e30 pad)
            ],
            out_specs=pl.BlockSpec((TB, HP), lambda b: (b, 0)),
        ),
        compiler_params=pltpu.CompilerParams(
            dimension_semantics=("parallel",)),
    )(chars_idxs.astype(jnp.int32), words_idxs.astype(jnp.int32),
      w_char, convb_pad, w1w, w1c, b1_pad, w2, b2_pad)
    return out[:, :Od]


# ----------------------- pure-JAX reference (for check) ----------------------
def tagger4_reference(words_idxs, chars_idxs, params, *, num_words, embed_size):
    ce = params["char_emb"][chars_idxs].astype(jnp.float32)      # (B, C, L)
    B, C, L = ce.shape
    W, b = params["conv_w"], params["conv_b"]                    # (O, C, 3), (O,)
    xp = jnp.pad(ce, ((0, 0), (0, 0), (1, 1)))
    conv = (jnp.einsum("bcl,oc->bol", xp[:, :, 0:L], W[:, :, 0])
            + jnp.einsum("bcl,oc->bol", xp[:, :, 1:L + 1], W[:, :, 1])
            + jnp.einsum("bcl,oc->bol", xp[:, :, 2:L + 2], W[:, :, 2]))
    conv = conv + b[None, :, None]
    chars_feat = jnp.max(conv, axis=2)                           # (B, O)
    we = params["word_emb"][words_idxs].astype(jnp.float32).reshape(B, -1)
    feat = jnp.concatenate([we, chars_feat], axis=1)
    h = jnp.tanh(feat @ params["W1"].T + params["b1"])
    logits = h @ params["W2"].T + params["b2"]
    return jax.nn.log_softmax(logits, axis=-1)


# --------------------------------- main ---------------------------------------
if __name__ == "__main__":
    # Model hyper-parameters (small, consistent with the module).
    vocab_size = 50
    embed_size = 16
    c_embed_size = 8
    chars_size = 8            # must equal c_embed_size for the original forward to run
    num_words = 5
    hidden_dim = 32
    out_dim = 10
    total_chars_in_corpus = 30

    key = jax.random.PRNGKey(0)
    ks = jax.random.split(key, 12)

    params = {
        "char_emb": 0.1 * jax.random.normal(ks[0], (total_chars_in_corpus, c_embed_size), jnp.float32),
        "word_emb": 0.1 * jax.random.normal(ks[1], (vocab_size, embed_size), jnp.float32),
        "conv_w": 0.1 * jax.random.normal(ks[2], (c_embed_size * 5, c_embed_size, 3), jnp.float32),
        "conv_b": 0.1 * jax.random.normal(ks[3], (c_embed_size * 5,), jnp.float32),
        "W1": 0.1 * jax.random.normal(ks[4], (hidden_dim, num_words * embed_size + c_embed_size * 5), jnp.float32),
        "b1": 0.1 * jax.random.normal(ks[5], (hidden_dim,), jnp.float32),
        "W2": 0.1 * jax.random.normal(ks[6], (out_dim, hidden_dim), jnp.float32),
        "b2": 0.1 * jax.random.normal(ks[7], (out_dim,), jnp.float32),
    }

    # B=2: single full-batch tile.  B=20: two tiles (TB=16) with a partial last
    # tile, locking in the padded-row behaviour flagged in the review.
    for t, B in enumerate((2, 20)):
        words_idxs = jax.random.randint(ks[8 + 2 * t], (B, num_words), 0, vocab_size, jnp.int32)
        chars_idxs = jax.random.randint(ks[9 + 2 * t], (B, chars_size), 0, total_chars_in_corpus, jnp.int32)

        out = tagger4_forward(words_idxs, chars_idxs, params,
                              num_words=num_words, embed_size=embed_size)
        out = jax.block_until_ready(out)

        ref = tagger4_reference(words_idxs, chars_idxs, params,
                                num_words=num_words, embed_size=embed_size)
        # bf16 (folded) matmul operands with f32 accumulate vs f32 reference.
        np.testing.assert_allclose(np.asarray(out), np.asarray(ref), rtol=2e-2, atol=2e-2)

    print("KERNEL_OK")
</pallas_src>

<mosaic_0001>
module attributes {stable_mosaic.version = 11 : i64} {
  func.func @tagger4_kernel(%arg0: i32, %arg1: memref<2x8xi32, #tpu.memory_space<vmem>>, %arg2: memref<2x5xi32, #tpu.memory_space<vmem>>, %arg3: memref<240x1024xbf16, #tpu.memory_space<vmem>>, %arg4: memref<1x128xf32, #tpu.memory_space<vmem>>, %arg5: memref<250x128xbf16, #tpu.memory_space<vmem>>, %arg6: memref<128x128xbf16, #tpu.memory_space<vmem>>, %arg7: memref<1x128xf32, #tpu.memory_space<vmem>>, %arg8: memref<128x128xbf16, #tpu.memory_space<vmem>>, %arg9: memref<1x128xf32, #tpu.memory_space<vmem>>, %arg10: memref<2x128xf32, #tpu.memory_space<vmem>>) attributes {dimension_semantics = [#tpu.dimension_semantics<parallel>], iteration_bounds = array<i64: 1>, scalar_prefetch = 0 : i64, scratch_operands = 0 : i64, tpu.core_type = #tpu.core_type<tc>, window_params = [{transform_indices = @transform_0, window_bounds = array<i64: 2, 8>}, {transform_indices = @transform_1, window_bounds = array<i64: 2, 5>}, {pipeline_mode = #tpu.pipeline_mode<synchronous>, transform_indices = @transform_2, window_bounds = array<i64: 240, 1024>}, {pipeline_mode = #tpu.pipeline_mode<synchronous>, transform_indices = @transform_3, window_bounds = array<i64: 1, 128>}, {pipeline_mode = #tpu.pipeline_mode<synchronous>, transform_indices = @transform_4, window_bounds = array<i64: 250, 128>}, {pipeline_mode = #tpu.pipeline_mode<synchronous>, transform_indices = @transform_5, window_bounds = array<i64: 128, 128>}, {pipeline_mode = #tpu.pipeline_mode<synchronous>, transform_indices = @transform_6, window_bounds = array<i64: 1, 128>}, {pipeline_mode = #tpu.pipeline_mode<synchronous>, transform_indices = @transform_7, window_bounds = array<i64: 128, 128>}, {pipeline_mode = #tpu.pipeline_mode<synchronous>, transform_indices = @transform_8, window_bounds = array<i64: 1, 128>}, {transform_indices = @transform_9, window_bounds = array<i64: 2, 128>}]} {
    %c0 = arith.constant 0 : index
    %c0_0 = arith.constant 0 : index
    %0 = vector.load %arg1[%c0, %c0_0] : memref<2x8xi32, #tpu.memory_space<vmem>>, vector<2x8xi32>
    %c8_i32 = arith.constant 8 : i32
    %1 = vector.broadcast %c8_i32 : i32 to vector<2x8xi32>
    %2 = arith.muli %0, %1 : vector<2x8xi32>
    %3 = tpu.iota {dimensions = array<i32: 1>} : vector<2x8xi32>
    %4 = arith.addi %2, %3 : vector<2x8xi32>
    %5 = tpu.concatenate %4, %4, %4, %4, %4, %4, %4, %4, %4, %4, %4, %4, %4, %4, %4, %4 in 1 : vector<2x8xi32>, vector<2x8xi32>, vector<2x8xi32>, vector<2x8xi32>, vector<2x8xi32>, vector<2x8xi32>, vector<2x8xi32>, vector<2x8xi32>, vector<2x8xi32>, vector<2x8xi32>, vector<2x8xi32>, vector<2x8xi32>, vector<2x8xi32>, vector<2x8xi32>, vector<2x8xi32>, vector<2x8xi32> -> vector<2x128xi32>
    %6 = tpu.concatenate %4, %4, %4, %4, %4, %4, %4, %4, %4, %4, %4, %4, %4, %4 in 1 : vector<2x8xi32>, vector<2x8xi32>, vector<2x8xi32>, vector<2x8xi32>, vector<2x8xi32>, vector<2x8xi32>, vector<2x8xi32>, vector<2x8xi32>, vector<2x8xi32>, vector<2x8xi32>, vector<2x8xi32>, vector<2x8xi32>, vector<2x8xi32>, vector<2x8xi32> -> vector<2x112xi32>
    %7 = tpu.concatenate %5, %6 in 1 : vector<2x128xi32>, vector<2x112xi32> -> vector<2x240xi32>
    %8 = tpu.iota {dimensions = array<i32: 1>} : vector<2x240xi32>
    %9 = arith.cmpi eq, %7, %8 : vector<2x240xi32>
    %cst = arith.constant 1.000000e+00 : f32
    %cst_1 = arith.constant 0.000000e+00 : f32
    %10 = vector.broadcast %cst : f32 to vector<2x240xf32>
    %11 = vector.broadcast %cst_1 : f32 to vector<2x240xf32>
    %12 = arith.select %9, %10, %11 : vector<2x240xi1>, vector<2x240xf32>
    %13 = arith.truncf %12 : vector<2x240xf32> to vector<2x240xbf16>
    %c0_2 = arith.constant 0 : index
    %c0_3 = arith.constant 0 : index
    %14 = vector.load %arg3[%c0_2, %c0_3] : memref<240x1024xbf16, #tpu.memory_space<vmem>>, vector<240x1024xbf16>
    %cst_4 = arith.constant dense<0.000000e+00> : vector<2x1024xf32>
    %15 = tpu.matmul %13, %14, %cst_4 {dimension_numbers = #tpu.dot_dimension_numbers<[1], [0], [0], [1], [0, 0, 1, 1], [], []>} : vector<2x240xbf16>, vector<240x1024xbf16>, vector<2x1024xf32> -> vector<2x1024xf32>
    %16 = vector.extract_strided_slice %15 {offsets = [0, 0], sizes = [2, 128], strides = [1, 1]} : vector<2x1024xf32> to vector<2x128xf32>
    %17 = vector.extract_strided_slice %15 {offsets = [0, 128], sizes = [2, 128], strides = [1, 1]} : vector<2x1024xf32> to vector<2x128xf32>
    %18 = arith.maximumf %16, %17 : vector<2x128xf32>
    %19 = vector.extract_strided_slice %15 {offsets = [0, 256], sizes = [2, 128], strides = [1, 1]} : vector<2x1024xf32> to vector<2x128xf32>
    %20 = arith.maximumf %18, %19 : vector<2x128xf32>
    %21 = vector.extract_strided_slice %15 {offsets = [0, 384], sizes = [2, 128], strides = [1, 1]} : vector<2x1024xf32> to vector<2x128xf32>
    %22 = arith.maximumf %20, %21 : vector<2x128xf32>
    %23 = vector.extract_strided_slice %15 {offsets = [0, 512], sizes = [2, 128], strides = [1, 1]} : vector<2x1024xf32> to vector<2x128xf32>
    %24 = arith.maximumf %22, %23 : vector<2x128xf32>
    %25 = vector.extract_strided_slice %15 {offsets = [0, 640], sizes = [2, 128], strides = [1, 1]} : vector<2x1024xf32> to vector<2x128xf32>
    %26 = arith.maximumf %24, %25 : vector<2x128xf32>
    %27 = vector.extract_strided_slice %15 {offsets = [0, 768], sizes = [2, 128], strides = [1, 1]} : vector<2x1024xf32> to vector<2x128xf32>
    %28 = arith.maximumf %26, %27 : vector<2x128xf32>
    %29 = vector.extract_strided_slice %15 {offsets = [0, 896], sizes = [2, 128], strides = [1, 1]} : vector<2x1024xf32> to vector<2x128xf32>
    %30 = arith.maximumf %28, %29 : vector<2x128xf32>
    %c0_5 = arith.constant 0 : index
    %c0_6 = arith.constant 0 : index
    %31 = vector.load %arg4[%c0_5, %c0_6] : memref<1x128xf32, #tpu.memory_space<vmem>>, vector<1x128xf32>
    %32 = vector.broadcast %31 : vector<1x128xf32> to vector<2x128xf32>
    %33 = arith.addf %30, %32 : vector<2x128xf32>
    %c0_7 = arith.constant 0 : index
    %c0_8 = arith.constant 0 : index
    %34 = vector.load %arg2[%c0_7, %c0_8] : memref<2x5xi32, #tpu.memory_space<vmem>>, vector<2x5xi32>
    %c5_i32 = arith.constant 5 : i32
    %35 = vector.broadcast %c5_i32 : i32 to vector<2x5xi32>
    %36 = arith.muli %34, %35 : vector<2x5xi32>
    %37 = tpu.iota {dimensions = array<i32: 1>} : vector<2x5xi32>
    %38 = arith.addi %36, %37 : vector<2x5xi32>
    %39 = tpu.concatenate %38, %38, %38, %38, %38, %38, %38, %38, %38, %38, %38, %38, %38, %38, %38, %38 in 1 : vector<2x5xi32>, vector<2x5xi32>, vector<2x5xi32>, vector<2x5xi32>, vector<2x5xi32>, vector<2x5xi32>, vector<2x5xi32>, vector<2x5xi32>, vector<2x5xi32>, vector<2x5xi32>, vector<2x5xi32>, vector<2x5xi32>, vector<2x5xi32>, vector<2x5xi32>, vector<2x5xi32>, vector<2x5xi32> -> vector<2x80xi32>
    %40 = tpu.concatenate %38, %38, %38, %38, %38, %38, %38, %38, %38, %38, %38, %38, %38, %38, %38, %38 in 1 : vector<2x5xi32>, vector<2x5xi32>, vector<2x5xi32>, vector<2x5xi32>, vector<2x5xi32>, vector<2x5xi32>, vector<2x5xi32>, vector<2x5xi32>, vector<2x5xi32>, vector<2x5xi32>, vector<2x5xi32>, vector<2x5xi32>, vector<2x5xi32>, vector<2x5xi32>, vector<2x5xi32>, vector<2x5xi32> -> vector<2x80xi32>
    %41 = tpu.concatenate %38, %38, %38, %38, %38, %38, %38, %38, %38, %38, %38, %38, %38, %38, %38, %38 in 1 : vector<2x5xi32>, vector<2x5xi32>, vector<2x5xi32>, vector<2x5xi32>, vector<2x5xi32>, vector<2x5xi32>, vector<2x5xi32>, vector<2x5xi32>, vector<2x5xi32>, vector<2x5xi32>, vector<2x5xi32>, vector<2x5xi32>, vector<2x5xi32>, vector<2x5xi32>, vector<2x5xi32>, vector<2x5xi32> -> vector<2x80xi32>
    %42 = tpu.concatenate %38, %38 in 1 : vector<2x5xi32>, vector<2x5xi32> -> vector<2x10xi32>
    %43 = tpu.concatenate %39, %40, %41, %42 in 1 : vector<2x80xi32>, vector<2x80xi32>, vector<2x80xi32>, vector<2x10xi32> -> vector<2x250xi32>
    %44 = tpu.iota {dimensions = array<i32: 1>} : vector<2x250xi32>
    %45 = arith.cmpi eq, %43, %44 : vector<2x250xi32>
    %cst_9 = arith.constant 1.000000e+00 : f32
    %cst_10 = arith.constant 0.000000e+00 : f32
    %46 = vector.broadcast %cst_9 : f32 to vector<2x250xf32>
    %47 = vector.broadcast %cst_10 : f32 to vector<2x250xf32>
    %48 = arith.select %45, %46, %47 : vector<2x250xi1>, vector<2x250xf32>
    %49 = arith.truncf %48 : vector<2x250xf32> to vector<2x250xbf16>
    %c0_11 = arith.constant 0 : index
    %c0_12 = arith.constant 0 : index
    %50 = vector.load %arg5[%c0_11, %c0_12] : memref<250x128xbf16, #tpu.memory_space<vmem>>, vector<250x128xbf16>
    %cst_13 = arith.constant dense<0.000000e+00> : vector<2x128xf32>
    %51 = tpu.matmul %49, %50, %cst_13 {dimension_numbers = #tpu.dot_dimension_numbers<[1], [0], [0], [1], [0, 0, 1, 1], [], []>} : vector<2x250xbf16>, vector<250x128xbf16>, vector<2x128xf32> -> vector<2x128xf32>
    %52 = arith.truncf %33 : vector<2x128xf32> to vector<2x128xbf16>
    %c0_14 = arith.constant 0 : index
    %c0_15 = arith.constant 0 : index
    %53 = vector.load %arg6[%c0_14, %c0_15] : memref<128x128xbf16, #tpu.memory_space<vmem>>, vector<128x128xbf16>
    %cst_16 = arith.constant dense<0.000000e+00> : vector<2x128xf32>
    %54 = tpu.matmul %52, %53, %cst_16 {dimension_numbers = #tpu.dot_dimension_numbers<[1], [0], [0], [1], [0, 0, 1, 1], [], []>} : vector<2x128xbf16>, vector<128x128xbf16>, vector<2x128xf32> -> vector<2x128xf32>
    %55 = arith.addf %51, %54 : vector<2x128xf32>
    %c0_17 = arith.constant 0 : index
    %c0_18 = arith.constant 0 : index
    %56 = vector.load %arg7[%c0_17, %c0_18] : memref<1x128xf32, #tpu.memory_space<vmem>>, vector<1x128xf32>
    %57 = vector.broadcast %56 : vector<1x128xf32> to vector<2x128xf32>
    %58 = arith.addf %55, %57 : vector<2x128xf32>
    %59 = math.tanh %58 : vector<2x128xf32>
    %60 = arith.truncf %59 : vector<2x128xf32> to vector<2x128xbf16>
    %c0_19 = arith.constant 0 : index
    %c0_20 = arith.constant 0 : index
    %61 = vector.load %arg8[%c0_19, %c0_20] : memref<128x128xbf16, #tpu.memory_space<vmem>>, vector<128x128xbf16>
    %cst_21 = arith.constant dense<0.000000e+00> : vector<2x128xf32>
    %62 = tpu.matmul %60, %61, %cst_21 {dimension_numbers = #tpu.dot_dimension_numbers<[1], [0], [0], [1], [0, 0, 1, 1], [], []>} : vector<2x128xbf16>, vector<128x128xbf16>, vector<2x128xf32> -> vector<2x128xf32>
    %c0_22 = arith.constant 0 : index
    %c0_23 = arith.constant 0 : index
    %63 = vector.load %arg9[%c0_22, %c0_23] : memref<1x128xf32, #tpu.memory_space<vmem>>, vector<1x128xf32>
    %64 = vector.broadcast %63 : vector<1x128xf32> to vector<2x128xf32>
    %65 = arith.addf %62, %64 : vector<2x128xf32>
    %cst_24 = arith.constant dense<0xFF800000> : vector<2xf32>
    %66 = vector.multi_reduction <maximumf>, %65, %cst_24 [1] : vector<2x128xf32> to vector<2xf32>
    %67 = vector.shape_cast %66 : vector<2xf32> to vector<2x1xf32>
    %68 = vector.broadcast %67 : vector<2x1xf32> to vector<2x128xf32>
    %69 = arith.subf %65, %68 : vector<2x128xf32>
    %70 = math.exp %69 : vector<2x128xf32>
    %cst_25 = arith.constant dense<0.000000e+00> : vector<2xf32>
    %71 = vector.multi_reduction <add>, %70, %cst_25 [1] : vector<2x128xf32> to vector<2xf32>
    %72 = vector.shape_cast %71 : vector<2xf32> to vector<2x1xf32>
    %73 = math.log %72 : vector<2x1xf32>
    %74 = vector.broadcast %73 : vector<2x1xf32> to vector<2x128xf32>
    %75 = arith.subf %69, %74 : vector<2x128xf32>
    %c0_26 = arith.constant 0 : index
    %c0_27 = arith.constant 0 : index
    %76 = vector.load %arg10[%c0_26, %c0_27] : memref<2x128xf32, #tpu.memory_space<vmem>>, vector<2x128xf32>
    tpu.vector_store %arg10[%c0_26, %c0_27], %75 {strides = array<i32>} : memref<2x128xf32, #tpu.memory_space<vmem>>, vector<2x128xf32>,
    return
  }
  func.func @transform_0(%arg0: i32) -> (i32, i32) {
    %c0_i32 = arith.constant 0 : i32
    %c0_i32_0 = arith.constant 0 : i32
    return %arg0, %c0_i32 : i32, i32
  }
  func.func @transform_1(%arg0: i32) -> (i32, i32) {
    %c0_i32 = arith.constant 0 : i32
    %c0_i32_0 = arith.constant 0 : i32
    return %arg0, %c0_i32 : i32, i32
  }
  func.func @transform_2(%arg0: i32) -> (i32, i32) {
    %c0_i32 = arith.constant 0 : i32
    %c0_i32_0 = arith.constant 0 : i32
    %c0_i32_1 = arith.constant 0 : i32
    return %c0_i32, %c0_i32_0 : i32, i32
  }
  func.func @transform_3(%arg0: i32) -> (i32, i32) {
    %c0_i32 = arith.constant 0 : i32
    %c0_i32_0 = arith.constant 0 : i32
    %c0_i32_1 = arith.constant 0 : i32
    return %c0_i32, %c0_i32_0 : i32, i32
  }
  func.func @transform_4(%arg0: i32) -> (i32, i32) {
    %c0_i32 = arith.constant 0 : i32
    %c0_i32_0 = arith.constant 0 : i32
    %c0_i32_1 = arith.constant 0 : i32
    return %c0_i32, %c0_i32_0 : i32, i32
  }
  func.func @transform_5(%arg0: i32) -> (i32, i32) {
    %c0_i32 = arith.constant 0 : i32
    %c0_i32_0 = arith.constant 0 : i32
    %c0_i32_1 = arith.constant 0 : i32
    return %c0_i32, %c0_i32_0 : i32, i32
  }
  func.func @transform_6(%arg0: i32) -> (i32, i32) {
    %c0_i32 = arith.constant 0 : i32
    %c0_i32_0 = arith.constant 0 : i32
    %c0_i32_1 = arith.constant 0 : i32
    return %c0_i32, %c0_i32_0 : i32, i32
  }
  func.func @transform_7(%arg0: i32) -> (i32, i32) {
    %c0_i32 = arith.constant 0 : i32
    %c0_i32_0 = arith.constant 0 : i32
    %c0_i32_1 = arith.constant 0 : i32
    return %c0_i32, %c0_i32_0 : i32, i32
  }
  func.func @transform_8(%arg0: i32) -> (i32, i32) {
    %c0_i32 = arith.constant 0 : i32
    %c0_i32_0 = arith.constant 0 : i32
    %c0_i32_1 = arith.constant 0 : i32
    return %c0_i32, %c0_i32_0 : i32, i32
  }
  func.func @transform_9(%arg0: i32) -> (i32, i32) {
    %c0_i32 = arith.constant 0 : i32
    %c0_i32_0 = arith.constant 0 : i32
    return %arg0, %c0_i32 : i32, i32
  }
}

</mosaic_0001>

<bundles_post_ra>
// kernel: tagger4_forward.1
= control target key start
LH: loop header
LB: loop body
LE: loop exit
PB: predicated region body
PF: predicated region fallthrough
CT: control target
= control target key end

     0   :  { %v36_v1 = vlaneseq  ;;  %s1858_s13 = smov 8   ;;  %s1859_s14 = smov 24   ;;  %s2553_s0 = inlined_call_operand.vmem [shape: s32[2,8], index: 0, kind: input, shape index: {}]   ;;  %s2554_s1 = inlined_call_operand.vmem [shape: s32[2,5], index: 1, kind: input, shape index: {}]   ;;  %s2555_s2 = inlined_call_operand.vmem [shape: bf16[240,1024], index: 2, kind: input, shape index: {}]   ;;  %s2556_s3 = inlined_call_operand.vmem [shape: f32[1,128], index: 3, kind: input, shape index: {}]   ;;  %s2557_s4 = inlined_call_operand.vmem [shape: bf16[250,128], index: 4, kind: input, shape index: {}]   ;;  %s2558_s5 = inlined_call_operand.vmem [shape: bf16[128,128], index: 5, kind: input, shape index: {}]   ;;  %s2559_s6 = inlined_call_operand.vmem [shape: f32[1,128], index: 6, kind: input, shape index: {}]   ;;  %s2560_s7 = inlined_call_operand.vmem [shape: bf16[128,128], index: 7, kind: input, shape index: {}]   ;;  %s2561_s8 = inlined_call_operand.vmem [shape: f32[1,128], index: 8, kind: input, shape index: {}]   ;;  %s2562_s9 = inlined_call_operand.hbm [shape: f32[2,128], index: 9, kind: output, shape index: {}]  }
   0x1   :  { %v34_v0 = vld [vmem:[%s2553_s0] sm:$0x3]  ;;  %v163_v7 = vld [vmem:[%s2555_s2 + $0x1c8] sm:$0xff]  ;;  %s1860_s22 = smov 16   ;;  %s1861_s23 = smov 32   ;;  %v2055_v60 = vld [vmem:[%s2555_s2 + $0x1d0] sm:$0xff] }
   0x2   :  { %v35_v2 = vmul.u32 8, %v34_v0  ;;  %v162_v3 = vld [vmem:[%s2555_s2 + $0x1c0] sm:$0xff]  ;;  %v1950_v5 = vand.u32 127, %v36_v1  ;;  %v167_v8 = vld [vmem:[%s2555_s2 + $0x1e8] sm:$0xff]  ;;  %s1862_s11 = smov 40   ;;  %s1863_s12 = smov 48  }
   0x3   :  { %v166_v4 = vld [vmem:[%s2555_s2 + $0x1e0] sm:$0xff]  ;;  %v1573_v11 = vcombine.high %v163_v7, %v167_v8  ;;  %v1572_v12 = vcombine.low %v163_v7, %v167_v8  ;;  %v155_v14 = vld [vmem:[%s2555_s2 + $0x188] sm:$0xff]  ;;  %s1864_s20 = smov 56   ;;  %s1865_s21 = smov 64   ;;  %v2060_v61 = vld [vmem:[%s2555_s2 + $0x1f0] sm:$0xff] }
   0x4   :  { %v1571_v6 = vcombine.high %v162_v3, %v166_v4  ;;  %v1570_v9 = vcombine.low %v162_v3, %v166_v4  ;;  %v154_v10 = vld [vmem:[%s2555_s2 + $0x180] sm:$0xff]  ;;  %v159_v15 = vld [vmem:[%s2555_s2 + $0x1a8] sm:$0xff]  ;;  %v1971_v16 = vadd.s32 %v1950_v5, %v35_v2  ;;  %s1866_s10 = smov 72   ;;  %v2065_v62 = vld [vmem:[%s2555_s2 + $0x1d8] sm:$0xff]  ;;  %v1574_v1 = vcombine.low %v2055_v60, %v2060_v61  ;;  %s1868_s30 = smov 88  }
   0x5   :  { %v158_v13 = vld [vmem:[%s2555_s2 + $0x1a0] sm:$0xff]  ;;  %v1565_v18 = vcombine.high %v155_v14, %v159_v15  ;;  %870 = vmatprep.subr.bf16.mxu1 %v1573_v11  ;;  %v147_v22 = vld [vmem:[%s2555_s2 + $0x148] sm:$0xff]  ;;  %v1564_v24 = vcombine.low %v155_v14, %v159_v15  ;;  %v2075_v2 = vld [vmem:[%s2555_s2 + $0x1f8] sm:$0xff]  ;;  %s1884_s24 = smov 65   ;;  %s1885_s25 = smov 70  }
   0x6   :  { %829 = vmatprep.subr.bf16.mxu0 %v1571_v6  ;;  %v1563_v17 = vcombine.high %v154_v10, %v158_v13  ;;  %v146_v19 = vld [vmem:[%s2555_s2 + $0x140] sm:$0xff]  ;;  %v1562_v21 = vcombine.low %v154_v10, %v158_v13  ;;  %v151_v23 = vld [vmem:[%s2555_s2 + $0x168] sm:$0xff]  ;;  %39 = vrot.lane.b32.xlu0 %v1971_v16, %s1858_s13  ;;  %v1576_v7 = vcombine.low %v2065_v62, %v2075_v2  ;;  %s1877_s13 = smov 25   ;;  %s1886_s26 = smov 75  }
   0x7   :  { %v150_v20 = vld [vmem:[%s2555_s2 + $0x160] sm:$0xff]  ;;  %830 = vmatpush1.bf16.msra.mxu0 %v1570_v9  ;;  %43 = vrot.lane.b32.xlu1 %v1971_v16, %s1859_s14  ;;  %v1557_v26 = vcombine.high %v147_v22, %v151_v23  ;;  %v139_v30 = vld [vmem:[%s2555_s2 + $0x108] sm:$0xff]  ;;  %v1556_v32 = vcombine.low %v147_v22, %v151_v23 }
   0x8   :  { %871 = vmatpush1.bf16.msra.mxu1 %v1572_v12  ;;  %831 = vmatprep.subr.bf16.mxu0 %v1563_v17  ;;  %v1555_v25 = vcombine.high %v146_v19, %v150_v20  ;;  %v138_v27 = vld [vmem:[%s2555_s2 + $0x100] sm:$0xff]  ;;  %v1554_v29 = vcombine.low %v146_v19, %v150_v20  ;;  %v143_v31 = vld [vmem:[%s2555_s2 + $0x128] sm:$0xff] }
   0x9   :  { %872 = vmatprep.subr.bf16.mxu1 %v1565_v18  ;;  %v142_v28 = vld [vmem:[%s2555_s2 + $0x120] sm:$0xff]  ;;  %v1549_v34 = vcombine.high %v139_v30, %v143_v31  ;;  %v131_v38 = vld [vmem:[%s2555_s2 + $0xc8] sm:$0xff]  ;;  %v1548_v40 = vcombine.low %v139_v30, %v143_v31 }
   0xa   :  { %41 = vrot.lane.b32.xlu0 %v1971_v16, %s1860_s22  ;;  %v1547_v33 = vcombine.high %v138_v27, %v142_v28  ;;  %v130_v35 = vld [vmem:[%s2555_s2 + $0xc0] sm:$0xff]  ;;  %v1546_v37 = vcombine.low %v138_v27, %v142_v28  ;;  %v135_v39 = vld [vmem:[%s2555_s2 + $0xe8] sm:$0xff]  ;;  %s1879_s22 = smov 35  }
   0xb   :  { %832 = vmatpush1.bf16.msra.mxu0 %v1562_v21  ;;  %45 = vrot.lane.b32.xlu1 %v1971_v16, %s1861_s23  ;;  %v134_v36 = vld [vmem:[%s2555_s2 + $0xe0] sm:$0xff]  ;;  %v1541_v42 = vcombine.high %v131_v38, %v135_v39  ;;  %v123_v46 = vld [vmem:[%s2555_s2 + $0x88] sm:$0xff]  ;;  %v1540_v48 = vcombine.low %v131_v38, %v135_v39 }
   0xc   :  { %873 = vmatpush1.bf16.msra.mxu1 %v1564_v24  ;;  %833 = vmatprep.subr.bf16.mxu0 %v1555_v25  ;;  %v1539_v41 = vcombine.high %v130_v35, %v134_v36  ;;  %v122_v43 = vld [vmem:[%s2555_s2 + $0x80] sm:$0xff]  ;;  %v1538_v45 = vcombine.low %v130_v35, %v134_v36  ;;  %v127_v47 = vld [vmem:[%s2555_s2 + $0xa8] sm:$0xff] }
   0xd   :  { %874 = vmatprep.subr.bf16.mxu1 %v1557_v26  ;;  %v126_v44 = vld [vmem:[%s2555_s2 + $0xa0] sm:$0xff]  ;;  %v1533_v50 = vcombine.high %v123_v46, %v127_v47  ;;  %v115_v54 = vld [vmem:[%s2555_s2 + $0x48] sm:$0xff]  ;;  %v1532_v58 = vcombine.low %v123_v46, %v127_v47 }
   0xe   :  { %47 = vrot.lane.b32.xlu0 %v1971_v16, %s1862_s11  ;;  %v1531_v49 = vcombine.high %v122_v43, %v126_v44  ;;  %v114_v51 = vld [vmem:[%s2555_s2 + $0x40] sm:$0xff]  ;;  %v1530_v53 = vcombine.low %v122_v43, %v126_v44  ;;  %v119_v55 = vld [vmem:[%s2555_s2 + $0x68] sm:$0xff] }
   0xf   :  { %834 = vmatpush1.bf16.msra.mxu0 %v1554_v29  ;;  %49 = vrot.lane.b32.xlu1 %v1971_v16, %s1863_s12  ;;  %v118_v52 = vld [vmem:[%s2555_s2 + $0x60] sm:$0xff]  ;;  %s1867_s12 = smov 80   ;;  %v1525_v63 = vcombine.high %v115_v54, %v119_v55  ;;  %v107_v4 = vld [vmem:[%s2555_s2 + $0x8] sm:$0xff]  ;;  %v1524_v11 = vcombine.low %v115_v54, %v119_v55 }
  0x10   :  { %875 = vmatpush1.bf16.msra.mxu1 %v1556_v32  ;;  %835 = vmatprep.subr.bf16.mxu0 %v1547_v33  ;;  %v1008_v56 = vld [vmem:[%s2554_s1] sm:$0x3]  ;;  %v1523_v59 = vcombine.high %v114_v51, %v118_v52  ;;  %v1522_v3 = vcombine.low %v114_v51, %v118_v52  ;;  %v111_v6 = vld [vmem:[%s2555_s2 + $0x28] sm:$0xff]  ;;  %s1871_s1 = smov 112  }
  0x11   :  { %876 = vmatprep.subr.bf16.mxu1 %v1549_v34  ;;  %v106_v57 = vld [vmem:[%s2555_s2] sm:$0xff]  ;;  %v1009_v8 = vmul.u32 5, %v1008_v56  ;;  %v1517_v13 = vcombine.high %v107_v4, %v111_v6  ;;  %v219_v15 = vld [vmem:[%s2555_s2 + $0x388] sm:$0xff]  ;;  %v1516_v21 = vcombine.low %v107_v4, %v111_v6 }
  0x12   :  { %51 = vrot.lane.b32.xlu0 %v1971_v16, %s1864_s20  ;;  %v110_v0 = vld [vmem:[%s2555_s2 + $0x20] sm:$0xff]  ;;  %v223_v17 = vld [vmem:[%s2555_s2 + $0x3a8] sm:$0xff]  ;;  %s1870_s20 = smov 104  }
  0x13   :  { %836 = vmatpush1.bf16.msra.mxu0 %v1546_v37  ;;  %53 = vrot.lane.b32.xlu1 %v1971_v16, %s1865_s21  ;;  %v218_v9 = vld [vmem:[%s2555_s2 + $0x380] sm:$0xff]  ;;  %v1515_v12 = vcombine.high %v106_v57, %v110_v0  ;;  %v1514_v14 = vcombine.low %v106_v57, %v110_v0  ;;  %v2103_v18 = vadd.s32 %v1009_v8, %v1950_v5  ;;  %v211_v25 = vld [vmem:[%s2555_s2 + $0x348] sm:$0xff]  ;;  %s1875_s21 = smov 15  }
  0x14   :  { %877 = vmatpush1.bf16.msra.mxu1 %v1548_v40  ;;  %837 = vmatprep.subr.bf16.mxu0 %v1539_v41  ;;  %v222_v10 = vld [vmem:[%s2555_s2 + $0x3a0] sm:$0xff]  ;;  %v1629_v23 = vcombine.high %v219_v15, %v223_v17  ;;  %v215_v26 = vld [vmem:[%s2555_s2 + $0x368] sm:$0xff]  ;;  %v1628_v29 = vcombine.low %v219_v15, %v223_v17  ;;  %v1575_v15 = vcombine.high %v2055_v60, %v2060_v61 }
  0x15   :  { %878 = vmatprep.subr.bf16.mxu1 %v1541_v42  ;;  %v210_v19 = vld [vmem:[%s2555_s2 + $0x340] sm:$0xff]  ;;  %v1627_v22 = vcombine.high %v218_v9, %v222_v10  ;;  %v1626_v24 = vcombine.low %v218_v9, %v222_v10  ;;  %v1621_v31 = vcombine.high %v211_v25, %v215_v26  ;;  %v203_v33 = vld [vmem:[%s2555_s2 + $0x308] sm:$0xff]  ;;  %v1620_v37 = vcombine.low %v211_v25, %v215_v26 }
  0x16   :  { %55 = vrot.lane.b32.xlu0 %v1971_v16, %s1866_s10  ;;  %s1869_s10 = smov 96   ;;  %v214_v20 = vld [vmem:[%s2555_s2 + $0x360] sm:$0xff]  ;;  %v207_v34 = vld [vmem:[%s2555_s2 + $0x328] sm:$0xff]  ;;  %v1577_v17 = vcombine.high %v2065_v62, %v2075_v2 }
  0x17   :  { %838 = vmatpush1.bf16.msra.mxu0 %v1538_v45  ;;  %57 = vrot.lane.b32.xlu1 %v1971_v16, %s1867_s12  ;;  %v202_v27 = vld [vmem:[%s2555_s2 + $0x300] sm:$0xff]  ;;  %v1619_v30 = vcombine.high %v210_v19, %v214_v20  ;;  %v1618_v32 = vcombine.low %v210_v19, %v214_v20  ;;  %v1613_v39 = vcombine.high %v203_v33, %v207_v34  ;;  %v195_v41 = vld [vmem:[%s2555_s2 + $0x2c8] sm:$0xff] }
  0x18   :  { %879 = vmatpush1.bf16.msra.mxu1 %v1540_v48  ;;  %839 = vmatprep.subr.bf16.mxu0 %v1531_v49  ;;  %v206_v28 = vld [vmem:[%s2555_s2 + $0x320] sm:$0xff]  ;;  %v199_v42 = vld [vmem:[%s2555_s2 + $0x2e8] sm:$0xff]  ;;  %v1612_v45 = vcombine.low %v203_v33, %v207_v34 }
  0x19   :  { %880 = vmatprep.subr.bf16.mxu1 %v1533_v50  ;;  %v194_v35 = vld [vmem:[%s2555_s2 + $0x2c0] sm:$0xff]  ;;  %v1611_v38 = vcombine.high %v202_v27, %v206_v28  ;;  %v1610_v40 = vcombine.low %v202_v27, %v206_v28  ;;  %v1605_v47 = vcombine.high %v195_v41, %v199_v42  ;;  %v187_v49 = vld [vmem:[%s2555_s2 + $0x288] sm:$0xff] }
  0x1a   :  { %59 = vrot.lane.b32.xlu0 %v1971_v16, %s1868_s30  ;;  %s1872_s30 = smov 120   ;;  %v198_v36 = vld [vmem:[%s2555_s2 + $0x2e0] sm:$0xff]  ;;  %v191_v50 = vld [vmem:[%s2555_s2 + $0x2a8] sm:$0xff] }
  0x1b   :  { %840 = vmatpush1.bf16.msra.mxu0 %v1530_v53  ;;  %61 = vrot.lane.b32.xlu1 %v1971_v16, %s1869_s10  ;;  %s1873_s10 = smov 5   ;;  %v186_v43 = vld [vmem:[%s2555_s2 + $0x280] sm:$0xff]  ;;  %v1603_v46 = vcombine.high %v194_v35, %v198_v36  ;;  %v1602_v48 = vcombine.low %v194_v35, %v198_v36  ;;  %v1604_v53 = vcombine.low %v195_v41, %v199_v42  ;;  %v179_v57 = vld [vmem:[%s2555_s2 + $0x248] sm:$0xff] }
  0x1c   :  { %881 = vmatpush1.bf16.msra.mxu1 %v1532_v58  ;;  %841 = vmatprep.subr.bf16.mxu0 %v1523_v59  ;;  %v190_v44 = vld [vmem:[%s2555_s2 + $0x2a0] sm:$0xff]  ;;  %v1597_v55 = vcombine.high %v187_v49, %v191_v50  ;;  %v183_v58 = vld [vmem:[%s2555_s2 + $0x268] sm:$0xff]  ;;  %v1596_v0 = vcombine.low %v187_v49, %v191_v50 }
  0x1d   :  { %882 = vmatprep.subr.bf16.mxu1 %v1525_v63  ;;  %v178_v51 = vld [vmem:[%s2555_s2 + $0x240] sm:$0xff]  ;;  %v1595_v54 = vcombine.high %v186_v43, %v190_v44  ;;  %v1594_v56 = vcombine.low %v186_v43, %v190_v44  ;;  %v1589_v4 = vcombine.high %v179_v57, %v183_v58  ;;  %v171_v8 = vld [vmem:[%s2555_s2 + $0x208] sm:$0xff]  ;;  %v1588_v10 = vcombine.low %v179_v57, %v183_v58 }
  0x1e   :  { %63 = vrot.lane.b32.xlu0 %v1971_v16, %s1870_s20  ;;  %s1874_s20 = smov 10   ;;  %v182_v52 = vld [vmem:[%s2555_s2 + $0x260] sm:$0xff]  ;;  %v175_v9 = vld [vmem:[%s2555_s2 + $0x228] sm:$0xff] }
  0x1f   :  { %842 = vmatpush1.bf16.msra.mxu0 %v1522_v3  ;;  %65 = vrot.lane.b32.xlu1 %v1971_v16, %s1871_s1  ;;  %v170_v59 = vld [vmem:[%s2555_s2 + $0x200] sm:$0xff]  ;;  %v1587_v3 = vcombine.high %v178_v51, %v182_v52  ;;  %v1586_v6 = vcombine.low %v178_v51, %v182_v52 }
  0x20   :  { %883 = vmatpush1.bf16.msra.mxu1 %v1524_v11  ;;  %843 = vmatprep.subr.bf16.mxu0 %v1515_v12  ;;  %v174_v63 = vld [vmem:[%s2555_s2 + $0x220] sm:$0xff]  ;;  %v1581_v12 = vcombine.high %v171_v8, %v175_v9 }
  0x21   :  { %884 = vmatprep.subr.bf16.mxu1 %v1517_v13  ;;  %v1579_v11 = vcombine.high %v170_v59, %v174_v63  ;;  %v1578_v13 = vcombine.low %v170_v59, %v174_v63 }
  0x22   :  { %67 = vrot.lane.b32.xlu0 %v1971_v16, %s1872_s30 }
  0x23   :  { %844 = vmatpush1.bf16.msra.mxu0 %v1514_v14  ;;  %1011 = vrot.lane.b32.xlu1 %v2103_v18, %s1873_s10  ;;  %s1876_s10 = smov 20   ;;  %v1580_v14 = vcombine.low %v171_v8, %v175_v9 }
  0x24   :  { %885 = vmatpush1.bf16.msra.mxu1 %v1516_v21  ;;  %847 = vmatprep.subr.bf16.mxu0 %v1627_v22 }
  0x25   :  { %888 = vmatprep.subr.bf16.mxu1 %v1629_v23 }
  0x26   :  { %1013 = vrot.lane.b32.xlu0 %v2103_v18, %s1874_s20  ;;  %s1881_s20 = smov 50  }
  0x27   :  { %848 = vmatpush2.bf16.msra.mxu0 %v1626_v24  ;;  %1015 = vrot.lane.b32.xlu1 %v2103_v18, %s1875_s21  ;;  %s1878_s21 = smov 30  }
  0x28   :  { %889 = vmatpush2.bf16.msra.mxu1 %v1628_v29  ;;  %849 = vmatprep.subr.bf16.mxu0 %v1619_v30 }
  0x29   :  { %890 = vmatprep.subr.bf16.mxu1 %v1621_v31 }
  0x2a   :  { %1017 = vrot.lane.b32.xlu0 %v2103_v18, %s1876_s10 }
  0x2b   :  { %850 = vmatpush2.bf16.msra.mxu0 %v1618_v32  ;;  %1019 = vrot.lane.b32.xlu1 %v2103_v18, %s1877_s13  ;;  %s1880_s13 = smov 45  }
  0x2c   :  { %891 = vmatpush2.bf16.msra.mxu1 %v1620_v37  ;;  %851 = vmatprep.subr.bf16.mxu0 %v1611_v38 }
  0x2d   :  { %892 = vmatprep.subr.bf16.mxu1 %v1613_v39 }
  0x2e   :  { %1021 = vrot.lane.b32.xlu0 %v2103_v18, %s1878_s21  ;;  %s1882_s21 = smov 55  }
  0x2f   :  { %852 = vmatpush2.bf16.msra.mxu0 %v1610_v40  ;;  %1023 = vrot.lane.b32.xlu1 %v2103_v18, %s1879_s22  ;;  %s1883_s22 = smov 60  }
  0x30   :  { %893 = vmatpush2.bf16.msra.mxu1 %v1612_v45  ;;  %853 = vmatprep.subr.bf16.mxu0 %v1603_v46 }
  0x31   :  { %894 = vmatprep.subr.bf16.mxu1 %v1605_v47 }
  0x32   :  { %1025 = vrot.lane.b32.xlu0 %v2103_v18, %s1862_s11 }
  0x33   :  { %854 = vmatpush2.bf16.msra.mxu0 %v1602_v48  ;;  %1027 = vrot.lane.b32.xlu1 %v2103_v18, %s1880_s13 }
  0x34   :  { %895 = vmatpush2.bf16.msra.mxu1 %v1604_v53  ;;  %855 = vmatprep.subr.bf16.mxu0 %v1595_v54 }
  0x35   :  { %896 = vmatprep.subr.bf16.mxu1 %v1597_v55 }
  0x36   :  { %1029 = vrot.lane.b32.xlu0 %v2103_v18, %s1881_s20 }
  0x37   :  { %856 = vmatpush2.bf16.msra.mxu0 %v1594_v56  ;;  %1031 = vrot.lane.b32.xlu1 %v2103_v18, %s1882_s21 }
  0x38   :  { %897 = vmatpush2.bf16.msra.mxu1 %v1596_v0  ;;  %857 = vmatprep.subr.bf16.mxu0 %v1587_v3 }
  0x39   :  { %898 = vmatprep.subr.bf16.mxu1 %v1589_v4 }
  0x3a   :  { %1033 = vrot.lane.b32.xlu0 %v2103_v18, %s1883_s22 }
  0x3b   :  { %858 = vmatpush2.bf16.msra.mxu0 %v1586_v6  ;;  %1035 = vrot.lane.b32.xlu1 %v2103_v18, %s1884_s24 }
  0x3c   :  { %899 = vmatpush2.bf16.msra.mxu1 %v1588_v10  ;;  %859 = vmatprep.subr.bf16.mxu0 %v1579_v11 }
  0x3d   :  { %900 = vmatprep.subr.bf16.mxu1 %v1581_v12 }
  0x3e   :  { %1037 = vrot.lane.b32.xlu0 %v2103_v18, %s1885_s25 }
  0x3f   :  { %860 = vmatpush2.bf16.msra.mxu0 %v1578_v13  ;;  %1039 = vrot.lane.b32.xlu1 %v2103_v18, %s1886_s26 }
  0x40   :  { %14 = vsyncpa [#allocation3], 0  ;;  %901 = vmatpush2.bf16.msra.mxu1 %v1580_v14  ;;  %911 = vmatprep.subr.bf16.mxu0 %v1575_v15  ;;  %vm69_vm0 = vcmask 64512   ;;  %vm71_vm1 = vcmask 130048   ;;  %vm73_vm2 = vcmask 195584   ;;  %vm75_vm3 = vcmask 261120  }
  0x41   :  { %952 = vmatprep.subr.bf16.mxu1 %v1577_v17  ;;  %vm77_vm4 = vcmask 326656   ;;  %vm79_vm5 = vcmask 392192   ;;  %vm81_vm6 = vcmask 457728   ;;  %vm83_vm7 = vcmask 523264   ;;  %v156_v48 = vld [vmem:[%s2555_s2 + $0x190] sm:$0xff]  ;;  %v157_v54 = vld [vmem:[%s2555_s2 + $0x198] sm:$0xff] }
  0x42   :  { %vm85_vm8 = vcmask 588800   ;;  %vm87_vm9 = vcmask 654336   ;;  %vm89_vm10 = vcmask 719872   ;;  %vm91_vm11 = vcmask 785408   ;;  %v160_v53 = vld [vmem:[%s2555_s2 + $0x1b0] sm:$0xff]  ;;  %v161_v55 = vld [vmem:[%s2555_s2 + $0x1b8] sm:$0xff] }
  0x43   :  { %vm93_vm12 = vcmask 850944   ;;  %v2203_v41 = vadd.s32 128, %v1950_v5  ;;  %vm95_vm13 = vcmask 916480   ;;  %vm97_vm15 = vcmask 982016   ;;  %v148_v58 = vld [vmem:[%s2555_s2 + $0x150] sm:$0xff]  ;;  %v149_v3 = vld [vmem:[%s2555_s2 + $0x158] sm:$0xff] }
  0x44   :  { %v1887_v46 = vmov 0.0   ;;  %v152_v59 = vld [vmem:[%s2555_s2 + $0x170] sm:$0xff]  ;;  %v1569_v0 = vcombine.high %v157_v54, %v161_v55  ;;  %v153_v4 = vld [vmem:[%s2555_s2 + $0x178] sm:$0xff]  ;;  %v1888_v6 = vmov 1.0|1.0   ;;  %v1566_v11 = vcombine.low %v156_v48, %v160_v53  ;;  %v1804_v63 = vld [vmem:[%s2557_s4 + $0x60] sm:$0xff]  }
  0x45   :  { %v1568_v12 = vcombine.low %v157_v54, %v161_v55  ;;  %v1559_v14 = vcombine.high %v148_v58, %v152_v59  ;;  %v1561_v15 = vcombine.high %v149_v3, %v153_v4  ;;  %v140_v60 = vld [vmem:[%s2555_s2 + $0x110] sm:$0xff]  ;;  %v141_v62 = vld [vmem:[%s2555_s2 + $0x118] sm:$0xff] }
  0x46   :  { %v144_v61 = vld [vmem:[%s2555_s2 + $0x130] sm:$0xff] }
  0x78   :  { %v40_v19 = vpop.permute.xlu0 %39 }
  0x79   :  { %v44_v20 = vpop.permute.xlu1 %43  ;;  %v70_v21 = vsel %vm69_vm0, %v1971_v16, %v40_v19  ;;  %vm1041_vm0 = vcmask 39936   ;;  %v1558_v19 = vcombine.low %v148_v58, %v152_v59 }
  0x7c   :  { %v42_v22 = vpop.permute.xlu0 %41 }
  0x7d   :  { %v46_v23 = vpop.permute.xlu1 %45  ;;  %v72_v24 = vsel %vm71_vm1, %v70_v21, %v42_v22  ;;  %v1551_v22 = vcombine.high %v140_v60, %v144_v61 }
  0x7e   :  { %v74_v25 = vsel %vm73_vm2, %v72_v24, %v44_v20  ;;  %vm1043_vm2 = vcmask 80896   ;;  %v1560_v20 = vcombine.low %v149_v3, %v153_v4  ;;  %v132_v24 = vld [vmem:[%s2555_s2 + $0xd0] sm:$0xff] }
  0x7f   :  { %v76_v26 = vsel %vm75_vm3, %v74_v25, %v46_v23  ;;  %v136_v25 = vld [vmem:[%s2555_s2 + $0xf0] sm:$0xff] }
  0x80   :  { %v48_v27 = vpop.permute.xlu0 %47  ;;  %v108_v3 = vld [vmem:[%s2555_s2 + $0x10] sm:$0xff] }
  0x81   :  { %v50_v28 = vpop.permute.xlu1 %49  ;;  %v78_v29 = vsel %vm77_vm4, %v76_v26, %v48_v27  ;;  %v133_v26 = vld [vmem:[%s2555_s2 + $0xd8] sm:$0xff]  ;;  %v112_v4 = vld [vmem:[%s2555_s2 + $0x30] sm:$0xff] }
  0x82   :  { %v80_v30 = vsel %vm79_vm5, %v78_v29, %v50_v28  ;;  %v137_v27 = vld [vmem:[%s2555_s2 + $0xf8] sm:$0xff] }
  0x84   :  { %v52_v31 = vpop.permute.xlu0 %51 }
  0x85   :  { %v54_v32 = vpop.permute.xlu1 %53  ;;  %v82_v33 = vsel %vm81_vm6, %v80_v30, %v52_v31  ;;  %vm1045_vm6 = vcmask 121856   ;;  %v1550_v31 = vcombine.low %v140_v60, %v144_v61  ;;  %v1519_v60 = vcombine.high %v108_v3, %v112_v4 }
  0x86   :  { %v84_v16 = vsel %vm83_vm7, %v82_v33, %v54_v32  ;;  %vm1047_vm7 = vcmask 162816  }
  0x88   :  { %v56_v34 = vpop.permute.xlu0 %55 }
  0x89   :  { %v58_v35 = vpop.permute.xlu1 %57  ;;  %v86_v36 = vsel %vm85_vm8, %v84_v16, %v56_v34  ;;  %vm1049_vm8 = vcmask 203776   ;;  %v1543_v16 = vcombine.high %v132_v24, %v136_v25  ;;  %v1545_v34 = vcombine.high %v133_v26, %v137_v27 }
  0x8a   :  { %v88_v37 = vsel %vm87_vm9, %v86_v36, %v58_v35  ;;  %v124_v35 = vld [vmem:[%s2555_s2 + $0x90] sm:$0xff] }
  0x8b   :  { %v128_v36 = vld [vmem:[%s2555_s2 + $0xb0] sm:$0xff] }
  0x8c   :  { %v60_v38 = vpop.permute.xlu0 %59 }
  0x8d   :  { %v62_v39 = vpop.permute.xlu1 %61  ;;  %v90_v40 = vsel %vm89_vm10, %v88_v37, %v60_v38  ;;  %vm1051_vm10 = vcmask 244736   ;;  %v125_v37 = vld [vmem:[%s2555_s2 + $0x98] sm:$0xff] }
  0x8e   :  { %v92_v42 = vsel %vm91_vm11, %v90_v40, %v62_v39  ;;  %vm1053_vm11 = vcmask 285696   ;;  %v129_v38 = vld [vmem:[%s2555_s2 + $0xb8] sm:$0xff] }
  0x8f   :  { %v1536_v58 = vcombine.low %v125_v37, %v129_v38 }
  0x90   :  { %v64_v43 = vpop.permute.xlu0 %63 }
  0x91   :  { %v66_v44 = vpop.permute.xlu1 %65  ;;  %v94_v45 = vsel %vm93_vm12, %v92_v42, %v64_v43  ;;  %vm1056_vm12 = vcmask 367616   ;;  %v1542_v43 = vcombine.low %v132_v24, %v136_v25 }
  0x92   :  { %vm101_vm14 = vcmp.eq.s32.totalorder %v94_v45, %v2203_v41  ;;  %v96_v50 = vsel %vm95_vm13, %v94_v45, %v66_v44  ;;  %v1544_v44 = vcombine.low %v133_v26, %v137_v27  ;;  %v212_v26 = vld [vmem:[%s2555_s2 + $0x350] sm:$0xff] }
  0x93   :  { %v103_v47 = vsel %vm101_vm14, 1.0, %v1887_v46  ;;  %vm1058_vm14 = vcmask 408576   ;;  %v216_v27 = vld [vmem:[%s2555_s2 + $0x370] sm:$0xff] }
  0x94   :  { %v105_v49 = vpack.c.bf16 %v103_v47, %v103_v47  ;;  %v68_v51 = vpop.permute.xlu0 %67  ;;  %v1535_v47 = vcombine.high %v124_v35, %v128_v36 }
  0x95   :  { %v1012_v52 = vpop.permute.xlu1 %1011  ;;  %v98_v56 = vsel %vm97_vm15, %v96_v50, %v68_v51  ;;  %vm1060_vm15 = vcmask 449536   ;;  %v120_v50 = vld [vmem:[%s2555_s2 + $0x70] sm:$0xff]  ;;  %v117_v51 = vld [vmem:[%s2555_s2 + $0x58] sm:$0xff] }
  0x96   :  { %vm100_vm1 = vcmp.eq.s32.totalorder %v98_v56, %v1950_v5  ;;  %v2222_v57 = vsel %vm1041_vm0, %v2103_v18, %v1012_v52  ;;  %1634 = vmatprep.mubr.msk.bf16.mxu0 %vm95_vm13, %v105_v49  ;;  %1637 = vmatprep.mubr.msk.bf16.mxu1 %vm95_vm13, %v105_v49  ;;  %v1567_v18 = vcombine.high %v156_v48, %v160_v53  ;;  %v121_v52 = vld [vmem:[%s2555_s2 + $0x78] sm:$0xff]  ;;  %vm1064_vm0 = vcmask 531456  }
  0x97   :  { %vm2232_vm5 = vmpackc.low %vm100_vm1, %vm100_vm1  ;;  %v1537_v48 = vcombine.high %v125_v37, %v129_v38  ;;  %v1534_v56 = vcombine.low %v124_v35, %v128_v36  ;;  %vm1066_vm1 = vcmask 572416   ;;  %v205_v35 = vld [vmem:[%s2555_s2 + $0x318] sm:$0xff]  ;;  %v1622_v37 = vcombine.low %v212_v26, %v216_v27 }
  0x98   :  { %1636 = vmatmul.mubr.msk.bf16.vlgmr.msra.gmra.mxu0 %vm2232_vm5, %v1888_v6  ;;  %1639 = vmatmul.mubr.msk.bf16.vlgmr.msra.gmra.mxu1 %vm2232_vm5, %v1888_v6  ;;  %v1014_v8 = vpop.permute.xlu0 %1013  ;;  %v209_v36 = vld [vmem:[%s2555_s2 + $0x338] sm:$0xff] }
  0x99   :  { %v1016_v9 = vpop.permute.xlu1 %1015  ;;  %912 = vmatpush1.bf16.msra.mxu0 %v1574_v1  ;;  %953 = vmatpush1.bf16.msra.mxu1 %v1576_v7  ;;  %v1044_v10 = vsel %vm1043_vm2, %v2222_v57, %v1014_v8  ;;  %v145_v1 = vld [vmem:[%s2555_s2 + $0x138] sm:$0xff]  ;;  %vm1068_vm2 = vcmask 613376  }
  0x9a   :  { %v1046_v13 = vsel %vm1045_vm6, %v1044_v10, %v1016_v9  ;;  %1640 = vmatprep.mubr.msk.bf16.mxu0 %vm95_vm13, %v105_v49  ;;  %1643 = vmatprep.mubr.msk.bf16.mxu1 %vm95_vm13, %v105_v49  ;;  %v1553_v23 = vcombine.high %v141_v62, %v145_v1  ;;  %v1552_v32 = vcombine.low %v141_v62, %v145_v1  ;;  %v116_v49 = vld [vmem:[%s2555_s2 + $0x50] sm:$0xff]  ;;  %v109_v8 = vld [vmem:[%s2555_s2 + $0x18] sm:$0xff]  ;;  %vm1321_vm6 = vcmask 1044480  }
  0x9b   :  { %913 = vmatprep.subr.bf16.mxu0 %v1567_v18  ;;  %954 = vmatprep.subr.bf16.mxu1 %v1569_v0  ;;  %v1527_v18 = vcombine.high %v116_v49, %v120_v50  ;;  %v1529_v0 = vcombine.high %v117_v51, %v121_v52  ;;  %v113_v9 = vld [vmem:[%s2555_s2 + $0x38] sm:$0xff]  ;;  %v220_v62 = vld [vmem:[%s2555_s2 + $0x390] sm:$0xff] }
  0x9c   :  { %v1018_v2 = vpop.permute.xlu0 %1017  ;;  %v1521_v61 = vcombine.high %v109_v8, %v113_v9  ;;  %v224_v1 = vld [vmem:[%s2555_s2 + $0x3b0] sm:$0xff] }
  0x9d   :  { %v1020_v7 = vpop.permute.xlu1 %1019  ;;  %914 = vmatpush1.bf16.msra.mxu0 %v1566_v11  ;;  %955 = vmatpush1.bf16.msra.mxu1 %v1568_v12  ;;  %v1048_v17 = vsel %vm1047_vm7, %v1046_v13, %v1018_v2  ;;  %v1526_v13 = vcombine.low %v116_v49, %v120_v50  ;;  %v221_v2 = vld [vmem:[%s2555_s2 + $0x398] sm:$0xff]  ;;  %v1631_v24 = vcombine.high %v220_v62, %v224_v1  ;;  %v188_v50 = vld [vmem:[%s2555_s2 + $0x290] sm:$0xff] }
  0x9e   :  { %v1050_v21 = vsel %vm1049_vm8, %v1048_v17, %v1020_v7  ;;  %915 = vmatprep.subr.bf16.mxu0 %v1559_v14  ;;  %956 = vmatprep.subr.bf16.mxu1 %v1561_v15  ;;  %v1528_v14 = vcombine.low %v117_v51, %v121_v52  ;;  %v225_v7 = vld [vmem:[%s2555_s2 + $0x3b8] sm:$0xff]  ;;  %v192_v51 = vld [vmem:[%s2555_s2 + $0x2b0] sm:$0xff] }
  0x9f   :  { %v1633_v25 = vcombine.high %v221_v2, %v225_v7  ;;  %v189_v52 = vld [vmem:[%s2555_s2 + $0x298] sm:$0xff] }
  0xa0   :  { %v1022_v28 = vpop.permute.xlu0 %1021 }
  0xa1   :  { %v1024_v29 = vpop.permute.xlu1 %1023  ;;  %916 = vmatpush1.bf16.msra.mxu0 %v1558_v19  ;;  %957 = vmatpush1.bf16.msra.mxu1 %v1560_v20  ;;  %v1052_v30 = vsel %vm1051_vm10, %v1050_v21, %v1022_v28  ;;  %v1518_v21 = vcombine.low %v108_v3, %v112_v4  ;;  %v213_v28 = vld [vmem:[%s2555_s2 + $0x358] sm:$0xff]  ;;  %v1598_v4 = vcombine.low %v188_v50, %v192_v51  ;;  %vm1317_vm10 = vcmask 998400  }
  0xa2   :  { %v1054_v33 = vsel %vm1053_vm11, %v1052_v30, %v1024_v29  ;;  %917 = vmatprep.subr.bf16.mxu0 %v1551_v22  ;;  %958 = vmatprep.subr.bf16.mxu1 %v1553_v23  ;;  %v1520_v22 = vcombine.low %v109_v8, %v113_v9  ;;  %v217_v29 = vld [vmem:[%s2555_s2 + $0x378] sm:$0xff]  ;;  %v1630_v30 = vcombine.low %v220_v62, %v224_v1 }
  0xa3   :  { %v1624_v38 = vcombine.low %v213_v28, %v217_v29  ;;  %v185_v3 = vld [vmem:[%s2555_s2 + $0x278] sm:$0xff] }
  0xa4   :  { %v1026_v39 = vpop.permute.xlu0 %1025 }
  0xa5   :  { %v1028_v40 = vpop.permute.xlu1 %1027  ;;  %918 = vmatpush1.bf16.msra.mxu0 %v1550_v31  ;;  %959 = vmatpush1.bf16.msra.mxu1 %v1552_v32  ;;  %v1055_v42 = vsel %vm77_vm4, %v1054_v33, %v1026_v39  ;;  %vm1062_vm4 = vcmask 490496   ;;  %v1632_v31 = vcombine.low %v221_v2, %v225_v7  ;;  %v1623_v32 = vcombine.high %v212_v26, %v216_v27  ;;  %v1798_v7 = vld [vmem:[%s2557_s4 + $0x78] sm:$0x1f]  }
  0xa6   :  { %v1057_v45 = vsel %vm1056_vm12, %v1055_v42, %v1028_v40  ;;  %919 = vmatprep.subr.bf16.mxu0 %v1543_v16  ;;  %960 = vmatprep.subr.bf16.mxu1 %v1545_v34  ;;  %v1625_v33 = vcombine.high %v213_v28, %v217_v29  ;;  %v204_v16 = vld [vmem:[%s2555_s2 + $0x310] sm:$0xff]  ;;  %v1814_v26 = vld [vmem:[%s2558_s5 + $0x38] sm:$0xff]  }
  0xa7   :  { %v208_v34 = vld [vmem:[%s2555_s2 + $0x330] sm:$0xff]  ;;  %v1807_v27 = vld [vmem:[%s2557_s4 + $0x18] sm:$0xff]  }
  0xa8   :  { %v1030_v53 = vpop.permute.xlu0 %1029  ;;  %v1615_v39 = vcombine.high %v204_v16, %v208_v34  ;;  %v196_v40 = vld [vmem:[%s2555_s2 + $0x2d0] sm:$0xff] }
  0xa9   :  { %v1032_v54 = vpop.permute.xlu1 %1031  ;;  %920 = vmatpush1.bf16.msra.mxu0 %v1542_v43  ;;  %961 = vmatpush1.bf16.msra.mxu1 %v1544_v44  ;;  %v1059_v55 = vsel %vm1058_vm14, %v1057_v45, %v1030_v53  ;;  %v200_v42 = vld [vmem:[%s2555_s2 + $0x2f0] sm:$0xff]  ;;  %v197_v43 = vld [vmem:[%s2555_s2 + $0x2d8] sm:$0xff]  ;;  %v1614_v45 = vcombine.low %v204_v16, %v208_v34  ;;  %v1817_v16 = vld [vmem:[%s2558_s5 + $0x20] sm:$0xff]  }
  0xaa   :  { %v1061_v59 = vsel %vm1060_vm15, %v1059_v55, %v1032_v54  ;;  %921 = vmatprep.subr.bf16.mxu0 %v1535_v47  ;;  %962 = vmatprep.subr.bf16.mxu1 %v1537_v48  ;;  %v201_v44 = vld [vmem:[%s2555_s2 + $0x2f8] sm:$0xff]  ;;  %v1616_v47 = vcombine.low %v205_v35, %v209_v36  ;;  %v1607_v48 = vcombine.high %v196_v40, %v200_v42  ;;  %v1815_v28 = vld [vmem:[%s2558_s5 + $0x30] sm:$0xff]   ;;  %v1812_v34 = vld [vmem:[%s2557_s4 + $0x40] sm:$0xff]  }
  0xab   :  { %v1609_v49 = vcombine.high %v197_v43, %v201_v44  ;;  %v193_v53 = vld [vmem:[%s2555_s2 + $0x2b8] sm:$0xff]  ;;  %v1606_v54 = vcombine.low %v196_v40, %v200_v42  ;;  %v1608_v55 = vcombine.low %v197_v43, %v201_v44  ;;  %v1808_v29 = vld [vmem:[%s2557_s4 + $0x50] sm:$0xff]  }
  0xac   :  { %v1034_v10 = vpop.permute.xlu0 %1033  ;;  %v1600_v8 = vcombine.low %v189_v52, %v193_v53 }
  0xad   :  { %v1036_v11 = vpop.permute.xlu1 %1035  ;;  %922 = vmatpush1.bf16.msra.mxu0 %v1534_v56  ;;  %963 = vmatpush1.bf16.msra.mxu1 %v1536_v58  ;;  %v1063_v12 = vsel %vm1062_vm4, %v1061_v59, %v1034_v10  ;;  %v1599_v56 = vcombine.high %v188_v50, %v192_v51  ;;  %v1601_v58 = vcombine.high %v189_v52, %v193_v53  ;;  %v180_v59 = vld [vmem:[%s2555_s2 + $0x250] sm:$0xff] }
  0xae   :  { %v1065_v15 = vsel %vm1064_vm0, %v1063_v12, %v1036_v11  ;;  %923 = vmatprep.subr.bf16.mxu0 %v1527_v18  ;;  %964 = vmatprep.subr.bf16.mxu1 %v1529_v0  ;;  %v184_v18 = vld [vmem:[%s2555_s2 + $0x270] sm:$0xff]  ;;  %v181_v0 = vld [vmem:[%s2555_s2 + $0x258] sm:$0xff] }
  0xaf   :  { %v1591_v9 = vcombine.high %v180_v59, %v184_v18  ;;  %v1593_v10 = vcombine.high %v181_v0, %v185_v3  ;;  %v172_v11 = vld [vmem:[%s2555_s2 + $0x210] sm:$0xff] }
  0xb0   :  { %v1038_v17 = vpop.permute.xlu0 %1037  ;;  %v176_v12 = vld [vmem:[%s2555_s2 + $0x230] sm:$0xff] }
  0xb1   :  { %v1040_v19 = vpop.permute.xlu1 %1039  ;;  %924 = vmatpush1.bf16.msra.mxu0 %v1526_v13  ;;  %965 = vmatpush1.bf16.msra.mxu1 %v1528_v14  ;;  %v1067_v20 = vsel %vm1066_vm1, %v1065_v15, %v1038_v17  ;;  %v173_v13 = vld [vmem:[%s2555_s2 + $0x218] sm:$0xff]  ;;  %v1590_v15 = vcombine.low %v180_v59, %v184_v18  ;;  %v1582_v1 = vcombine.low %v172_v11, %v176_v12 }
  0xb2   :  { %925 = vmatprep.subr.bf16.mxu0 %v1519_v60  ;;  %966 = vmatprep.subr.bf16.mxu1 %v1521_v61  ;;  %v2331_v23 = vsel %vm1068_vm2, %v1067_v20, %v1040_v19  ;;  %v177_v14 = vld [vmem:[%s2555_s2 + $0x238] sm:$0xff]  ;;  %v1592_v60 = vcombine.low %v181_v0, %v185_v3  ;;  %v1583_v61 = vcombine.high %v172_v11, %v176_v12  ;;  %v1800_v19 = vld [vmem:[%s2557_s4 + $0x70] sm:$0xff]  }
  0xb3   :  { %1070 = vrot.lane.b32.xlu0 %v2331_v23, %s1867_s12  ;;  %1072 = vrot.lane.b32.xlu1 %v2331_v23, %s1861_s23  ;;  %v1585_v62 = vcombine.high %v173_v13, %v177_v14  ;;  %v1584_v2 = vcombine.low %v173_v13, %v177_v14  ;;  %v1799_v17 = vld [vmem:[%s2557_s4 + $0x38] sm:$0xff]   ;;  %v1801_v20 = vld [vmem:[%s2557_s4 + $0x30] sm:$0xff]  }
  0xb5   :  { %926 = vmatpush1.bf16.msra.mxu0 %v1518_v21  ;;  %967 = vmatpush1.bf16.msra.mxu1 %v1520_v22  ;;  %v1802_v21 = vld [vmem:[%s2557_s4 + $0x68] sm:$0xff]  }
  0xb6   :  { %929 = vmatprep.subr.bf16.mxu0 %v1631_v24  ;;  %970 = vmatprep.subr.bf16.mxu1 %v1633_v25  ;;  %v1803_v22 = vld [vmem:[%s2557_s4 + $0x28] sm:$0xff]   ;;  %v1805_v24 = vld [vmem:[%s2557_s4 + $0x20] sm:$0xff]   ;;  %v1806_v25 = vld [vmem:[%s2557_s4 + $0x58] sm:$0xff]  }
  0xb7   :  { %1074 = vrot.lane.b32.xlu0 %v2222_v57, %s1871_s1  ;;  %v1617_v57 = vcombine.high %v205_v35, %v209_v36  ;;  %v1813_v35 = vld [vmem:[%s2557_s4] sm:$0xff]   ;;  %v1818_v36 = vld [vmem:[%s2558_s5 + $0x18] sm:$0xff]  }
  0xb9   :  { %930 = vmatpush2.bf16.msra.mxu0 %v1630_v30  ;;  %971 = vmatpush2.bf16.msra.mxu1 %v1632_v31  ;;  %v1809_v30 = vld [vmem:[%s2557_s4 + $0x10] sm:$0xff]   ;;  %v1816_v31 = vld [vmem:[%s2558_s5 + $0x28] sm:$0xff]  }
  0xba   :  { %931 = vmatprep.subr.bf16.mxu0 %v1623_v32  ;;  %972 = vmatprep.subr.bf16.mxu1 %v1625_v33  ;;  %v1810_v32 = vld [vmem:[%s2557_s4 + $0x48] sm:$0xff]  }
  0xbb   :  { %v1811_v33 = vld [vmem:[%s2557_s4 + $0x8] sm:$0xff]  }
  0xbd   :  { %932 = vmatpush2.bf16.msra.mxu0 %v1622_v37  ;;  %973 = vmatpush2.bf16.msra.mxu1 %v1624_v38  ;;  %v1819_v37 = vld [vmem:[%s2558_s5 + $0x10] sm:$0xff]   ;;  %v1820_v38 = vld [vmem:[%s2558_s5 + $0x8] sm:$0xff]  }
  0xbe   :  { %933 = vmatprep.subr.bf16.mxu0 %v1615_v39  ;;  %974 = vmatprep.subr.bf16.mxu1 %v1617_v57  ;;  %v1821_v39 = vld [vmem:[%s2558_s5] sm:$0xff]  }
  0xc1   :  { %934 = vmatpush2.bf16.msra.mxu0 %v1614_v45  ;;  %975 = vmatpush2.bf16.msra.mxu1 %v1616_v47 }
  0xc2   :  { %935 = vmatprep.subr.bf16.mxu0 %v1607_v48  ;;  %976 = vmatprep.subr.bf16.mxu1 %v1609_v49 }
  0xc5   :  { %936 = vmatpush2.bf16.msra.mxu0 %v1606_v54  ;;  %977 = vmatpush2.bf16.msra.mxu1 %v1608_v55 }
  0xc6   :  { %937 = vmatprep.subr.bf16.mxu0 %v1599_v56  ;;  %978 = vmatprep.subr.bf16.mxu1 %v1601_v58 }
  0xc9   :  { %938 = vmatpush2.bf16.msra.mxu0 %v1598_v4  ;;  %979 = vmatpush2.bf16.msra.mxu1 %v1600_v8 }
  0xca   :  { %939 = vmatprep.subr.bf16.mxu0 %v1591_v9  ;;  %980 = vmatprep.subr.bf16.mxu1 %v1593_v10  ;;  %v1646_v10 = vld [vmem:[%s2556_s3] ss:$0 sm:$0xff] }
  0xcd   :  { %940 = vmatpush2.bf16.msra.mxu0 %v1590_v15  ;;  %981 = vmatpush2.bf16.msra.mxu1 %v1592_v60  ;;  %v1822_v15 = vld [vmem:[%s2560_s7 + $0x38] sm:$0xff]  }
  0xce   :  { %941 = vmatprep.subr.bf16.mxu0 %v1583_v61  ;;  %982 = vmatprep.subr.bf16.mxu1 %v1585_v62  ;;  %v1823_v61 = vld [vmem:[%s2560_s7 + $0x30] sm:$0xff]   ;;  %v1824_v62 = vld [vmem:[%s2560_s7 + $0x28] sm:$0xff]  }
  0xd1   :  { %942 = vmatpush2.bf16.msra.mxu0 %v1582_v1  ;;  %983 = vmatpush2.bf16.msra.mxu1 %v1584_v2  ;;  %v1825_v1 = vld [vmem:[%s2560_s7 + $0x20] sm:$0xff]   ;;  %v1826_v2 = vld [vmem:[%s2560_s7 + $0x18] sm:$0xff]  }
  0xd2   :  { %1764 = vmatprep.subr.msk.bf16.mxu1 %vm1321_vm6, %v1798_v7  ;;  %1724 = vmatprep.subr.bf16.mxu0 %v1887_v46  ;;  %v1827_v7 = vld [vmem:[%s2560_s7 + $0x10] sm:$0xff]  }
  0xd4   :  { %1642 = vmatmul.mubr.msk.bf16.vlgmr.msra.gmra.mxu0 %vm2232_vm5, %v1888_v6  ;;  %1645 = vmatmul.mubr.msk.bf16.vlgmr.msra.gmra.mxu1 %vm2232_vm5, %v1888_v6  ;;  %vm1889_vm5 = vmmov 0  }
  0xd5   :  { %1694 = vmatpush3.bf16.msra.mxu1 %v1799_v17  ;;  %1725 = vmatpush3.bf16.msra.mxu0 %v1814_v26  ;;  %v1828_v17 = vld [vmem:[%s2560_s7 + $0x8] sm:$0xff]   ;;  %v1674_v26 = vld [vmem:[%s2559_s6] ss:$0 sm:$0xff]  ;;  %s1890_s6 = smov [#allocation2]  }
  0xd6   :  { %1695 = vmatprep.subr.bf16.mxu1 %v1800_v19  ;;  %1726 = vmatprep.subr.bf16.mxu0 %v1887_v46 }
  0xd7   :  { %1740 = vmatprep.mubr.msk.bf16.mxu0 %vm1889_vm5, %v1887_v46 }
  0xd9   :  { %1696 = vmatpush3.bf16.msra.mxu1 %v1801_v20  ;;  %1727 = vmatpush3.bf16.msra.mxu0 %v1815_v28  ;;  %v1829_v20 = vld [vmem:[%s2560_s7] sm:$0xff]  }
  0xda   :  { %1697 = vmatprep.subr.bf16.mxu1 %v1802_v21  ;;  %1728 = vmatprep.subr.bf16.mxu0 %v1887_v46 }
  0xdd   :  { %1698 = vmatpush3.bf16.msra.mxu1 %v1803_v22  ;;  %1729 = vmatpush3.bf16.msra.mxu0 %v1816_v31 }
  0xde   :  { %1699 = vmatprep.subr.bf16.mxu1 %v1804_v63  ;;  %1730 = vmatprep.subr.bf16.mxu0 %v1887_v46 }
  0xe1   :  { %1700 = vmatpush3.bf16.msra.mxu1 %v1805_v24  ;;  %1731 = vmatpush3.bf16.msra.mxu0 %v1817_v16 }
  0xe2   :  { %1701 = vmatprep.subr.bf16.mxu1 %v1806_v25  ;;  %1732 = vmatprep.subr.bf16.mxu0 %v1887_v46 }
  0xe5   :  { %1702 = vmatpush3.bf16.msra.mxu1 %v1807_v27  ;;  %1733 = vmatpush3.bf16.msra.mxu0 %v1818_v36 }
  0xe6   :  { %1703 = vmatprep.subr.bf16.mxu1 %v1808_v29  ;;  %1734 = vmatprep.subr.bf16.mxu0 %v1887_v46 }
  0xe9   :  { %1704 = vmatpush3.bf16.msra.mxu1 %v1809_v30  ;;  %1735 = vmatpush3.bf16.msra.mxu0 %v1819_v37 }
  0xea   :  { %1705 = vmatprep.subr.bf16.mxu1 %v1810_v32  ;;  %1736 = vmatprep.subr.bf16.mxu0 %v1887_v46 }
  0xed   :  { %1706 = vmatpush3.bf16.msra.mxu1 %v1811_v33  ;;  %1737 = vmatpush3.bf16.msra.mxu0 %v1820_v38  ;;  %v1675_v33 = vld [vmem:[%s2561_s8] ss:$0 sm:$0xff]  ;;  %s1506_s8 = sshll.u32 %s1890_s6, 4  ;;  %s1507_s8 = int_to_ptr.vmem [resolvable:$true] %s1506_s8 }
  0xee   :  { %1707 = vmatprep.subr.bf16.mxu1 %v1812_v34  ;;  %1738 = vmatprep.subr.bf16.mxu0 %v1887_v46  ;;  %s1836_s27 = scalar_lea.vmem %s1507_s8, 32  ;;  %p1841_p1 = scmp.lt.s32.totalorder %s1507_s8, %s1507_s8 }
  0xef   :  { %p1837_p0 = scmp.ne.s32.totalorder %s1507_s8, %s1836_s27  ;;  %p1842_p2 = scmp.lt.s32.totalorder %s1836_s27, %s1836_s27 }
  0xf1   :  { %1708 = vmatpush3.bf16.msra.mxu1 %v1813_v35  ;;  %1739 = vmatpush3.bf16.msra.mxu0 %v1821_v39  ;;  %p1843_p3 = por %p1842_p2, %p1841_p1 }
  0xf2   :  { %1744 = vmatprep.subr.bf16.mxu0 %v1887_v46 }
  0xf3   :  { %p1844_p4 = pnand %p1843_p3, %p1837_p0 }
 0x125   :  { %v1071_v57 = vpop.permute.xlu0 %1070  ;;  %v1073_v40 = vpop.permute.xlu1 %1072 }
 0x126   :  { %v1077_v42 = vsel %vm75_vm3, %v1071_v57, %v1073_v40  ;;  %v1076_v43 = vsel %vm87_vm9, %v2331_v23, %v1071_v57  ;;  %vm1486_vm3 = vcmask 1041408  }
 0x127   :  { %vm1079_vm8 = vcmp.eq.s32.totalorder %v1076_v43, %v1950_v5 }
 0x128   :  { %vm1672_vm11 = vmpackc.low %vm1079_vm8, %vm1079_vm8 }
 0x129   :  { %v1075_v44 = vpop.permute.xlu0 %1074 }
 0x12a   :  { %v1078_v45 = vsel %vm95_vm13, %v1077_v42, %v1075_v44 }
 0x12b   :  { %vm1080_vm7 = vcmp.eq.s32.totalorder %v1078_v45, %v2203_v41 }
 0x12c   :  { %v1082_v47 = vsel %vm1080_vm7, 1.0, %v1887_v46 }
 0x12d   :  { %v1084_v48 = vpack.c.bf16 %v1082_v47, %v1082_v47 }
 0x12f   :  { %1671 = vmatprep.mubr.msk.bf16.mxu1 %vm1317_vm10, %v1084_v48 }
 0x130   :  { %1673 = vmatmul.mubr.msk.bf16.vlgmr.msra.gmra.mxu1 %vm1672_vm11, %v1888_v6 }
 0x158   :  { %v863_v49 = vpop.f32.mrf.mxu0  ;;  %v904_v50 = vpop.f32.mrf.mxu1 }
 0x15a   :  { %v865_v51 = vpop.f32.mrf.mxu0  ;;  %v906_v52 = vpop.f32.mrf.mxu1 }
 0x15b   :  { %v993_v56 = vmax.f32 %v863_v49, %v865_v51 }
 0x15c   :  { %v867_v23 = vpop.f32.mrf.mxu0  ;;  %v908_v53 = vpop.f32.mrf.mxu1 }
 0x15d   :  { %v994_v41 = vmax.f32 %v993_v56, %v904_v50 }
 0x15e   :  { %v868_v54 = vpop.f32.mrf.mxu0  ;;  %v909_v55 = vpop.f32.mrf.mxu1 }
 0x15f   :  { %v995_v58 = vmax.f32 %v994_v41, %v906_v52 }
 0x194   :  { %v945_v5 = vpop.f32.mrf.mxu0  ;;  %v986_v59 = vpop.f32.mrf.mxu1 }
 0x195   :  { %v996_v18 = vmax.f32 %v995_v58, %v945_v5 }
 0x196   :  { %v947_v0 = vpop.f32.mrf.mxu0  ;;  %v988_v3 = vpop.f32.mrf.mxu1 }
 0x197   :  { %v997_v4 = vmax.f32 %v996_v18, %v947_v0 }
 0x198   :  { %v949_v8 = vpop.f32.mrf.mxu0  ;;  %v990_v9 = vpop.f32.mrf.mxu1 }
 0x199   :  { %v998_v6 = vmax.f32 %v997_v4, %v986_v59 }
 0x19a   :  { %v950_v11 = vpop.f32.mrf.mxu0  ;;  %v991_v12 = vpop.f32.mrf.mxu1 }
 0x19b   :  { %v999_v13 = vmax.f32 %v998_v6, %v988_v3 }
 0x19d   :  { %v1007_v14 = vadd.f32 %v1646_v10, %v999_v13 }
 0x19f   :  { %v1117_v60 = vpack.c.bf16 %v1007_v14, %v1007_v14 }
 0x1a1   :  { %1741 = vmatmul.mubr.bf16.vlgmr.msra.gmra.mxu0 %v1117_v60 }
 0x1a2   :  { %1745 = vmatpush3.bf16.msra.mxu0 %v1822_v15  ;;  %1760 = vmatprep.mubr.msk.bf16.mxu0 %vm1889_vm5, %v1887_v46 }
 0x1a3   :  { %1746 = vmatprep.subr.bf16.mxu0 %v1887_v46 }
 0x1a6   :  { %1747 = vmatpush3.bf16.msra.mxu0 %v1823_v61 }
 0x1a7   :  { %1748 = vmatprep.subr.bf16.mxu0 %v1887_v46 }
 0x1aa   :  { %1749 = vmatpush3.bf16.msra.mxu0 %v1824_v62 }
 0x1ab   :  { %1750 = vmatprep.subr.bf16.mxu0 %v1887_v46 }
 0x1ae   :  { %1751 = vmatpush3.bf16.msra.mxu0 %v1825_v1 }
 0x1af   :  { %1752 = vmatprep.subr.bf16.mxu0 %v1887_v46 }
 0x1b2   :  { %1753 = vmatpush3.bf16.msra.mxu0 %v1826_v2 }
 0x1b3   :  { %1754 = vmatprep.subr.bf16.mxu0 %v1887_v46 }
 0x1b6   :  { %1755 = vmatpush3.bf16.msra.mxu0 %v1827_v7 }
 0x1b7   :  { %1756 = vmatprep.subr.bf16.mxu0 %v1887_v46 }
 0x1ba   :  { %1757 = vmatpush3.bf16.msra.mxu0 %v1828_v17 }
 0x1bb   :  { %1758 = vmatprep.subr.bf16.mxu0 %v1887_v46 }
 0x1be   :  { %1759 = vmatpush3.bf16.msra.mxu0 %v1829_v20 }
 0x1f0   :  { %v1709_v19 = vpop.f32.mrf.mxu1 }
 0x1f2   :  { %v1710_v21 = vpop.f32.mrf.mxu1 }
 0x1f3   :  { %v1711_v22 = vadd.f32 %v1710_v21, %v1709_v19 }
 0x1f4   :  { %v1712_v63 = vpop.f32.mrf.mxu1 }
 0x1f6   :  { %v1713_v24 = vpop.f32.mrf.mxu1 }
 0x261   :  { %v1216_v25 = vpop.f32.mrf.mxu0 }
 0x262   :  { %v1360_v27 = vadd.f32 %v1711_v22, %v1216_v25 }
 0x263   :  { %v1742_v28 = vpop.f32.mrf.mxu0 }
 0x264   :  { %v1372_v29 = vadd.f32 %v1674_v26, %v1360_v27 }
 0x265   :  { %v1219_v30 = vpop.f32.mrf.mxu0 }
 0x266   :  { %1830 = vtanh.f32 %v1372_v29 }
 0x267   :  { %v1743_v46 = vpop.f32.mrf.mxu0 }
 0x273   :  { %v1831_v31 = vpop.eup %1830 }
 0x274   :  { %v1374_v32 = vpack.c.bf16 %v1831_v31, %v1831_v31 }
 0x276   :  { %1761 = vmatmul.mubr.bf16.vlgmr.msra.gmra.mxu0 %v1374_v32 }
 0x336   :  { %v1480_v16 = vpop.f32.mrf.mxu0 }
 0x337   :  { %v1481_v34 = vadd.f32 %v1675_v33, %v1480_v16 }
 0x338   :  { %v1762_v35 = vpop.f32.mrf.mxu0 }
 0x339   :  { %v1487_v36 = vsel %vm1486_vm3, %v1481_v34, -inf }
 0x33a   :  { %1488 = vmax.xlane.f32.xlu1 %v1487_v36  ;;  %v1483_v37 = vpop.f32.mrf.mxu0 }
 0x33c   :  { %v1763_v38 = vpop.f32.mrf.mxu0 }
 0x3c3   :  { %v1489_v39 = vpop.xlane.xlu1 %1488 }
 0x3c4   :  { %v1490_v57 = vsub.f32 %v1481_v34, %v1489_v39 }
 0x3c6   :  { %v1491_v40 = vmul.f32 1.442695, %v1490_v57 }
 0x3c8   :  { %1832 = vpow2.f32 %v1491_v40 }
 0x3d5   :  { %v1833_v42 = vpop.eup %1832 }
 0x3d6   :  { %v1493_v43 = vsel %vm1486_vm3, %v1833_v42, 0.0 }
 0x3d7   :  { %1494 = vadd.xlane.f32.xlu0 %v1493_v43 }
 0x460   :  { %v1495_v44 = vpop.xlane.xlu0 %1494 }
 0x461   :  { %1834 = vlog2.f32 %v1495_v44 }
 0x46e   :  { %v1835_v45 = vpop.eup %1834 }
 0x46f   :  { %v1497_v47 = vmul.f32 0.6931472, %v1835_v45 }
 0x471   :  { %v1498_v48 = vsub.f32 %v1490_v57, %v1497_v47 }
 0x473   :  { %1499 = vst [vmem:[#allocation2] sm:$0x3] %v1498_v48 }
 0x474   :  { %1847 = shalt.err (!%p1844_p4)
}
 0x475   :  { %1509 = dma.vmem_to_hbm [thread:$0]  %s1507_s8, 32, %s2562_s9, [#allocation3]  }
 0x476   :  { %1856 = dma.done.wait [#allocation3], 32  }
 0x477   :  { %1857 = vsyncadd [#allocation3], 4294967264 }
 0x478   :  { %1513 = vsyncpa [#allocation3], 1 }

</bundles_post_ra>
